<compile_context>
chip_gen: v5e
topology: v5e:2x2
jax: 0.10.0
libtpu: 0.0.40
codegen_flags: <defaults>
</compile_context>

<pallas_src>
import functools

import jax
import jax.numpy as jnp
import numpy as np
from jax.experimental import pallas as pl
from jax.experimental.pallas import tpu as pltpu

LANE = 128                      # channel padding width -> lane-dense matmuls / stores
_VMEM_LIMIT = 32 * 1024 * 1024  # safe on all generations (v7x physical VMEM is 64 MiB)


def _round_up(v, m):
    return ((v + m - 1) // m) * m


def _pick_tiles(n_pad):
    """Largest tiles (<=512, multiples of 128) dividing n_pad; keep >=2 row tiles (v7x 2-TC)."""
    tile_k = 128
    for t in (512, 256, 128):
        if n_pad % t == 0:
            tile_k = t
            break
    tile_m = 128
    for t in (512, 256, 128):
        if n_pad % t == 0 and (n_pad // t >= 2 or n_pad == 128):
            tile_m = t
            break
    return tile_m, tile_k


# ----------------------------------------------------------------------------- kernel
def gcn_layer_kernel(a_ref, h_ref, w_ref, b_ref, o_ref, acc_ref, *, tile_k, apply_relu):
    """Fused GCN layer tile: acc[i] = sum_k A[i,k] @ H[k];  out[i] = act(acc[i] @ W + b)."""
    k = pl.program_id(1)

    start = pl.multiple_of(k * tile_k, tile_k)
    h_tile = h_ref[pl.ds(start, tile_k), :]                      # resident H, sliced per k
    contrib = jnp.dot(a_ref[...], h_tile, preferred_element_type=jnp.float32)

    @pl.when(k == 0)
    def _():
        acc_ref[...] = contrib                                   # direct store, no zero-init

    @pl.when(k > 0)
    def _():
        acc_ref[...] += contrib

    @pl.when(k == pl.num_programs(1) - 1)
    def _():
        y = jnp.dot(acc_ref[...].astype(jnp.bfloat16), w_ref[...],
                    preferred_element_type=jnp.float32)
        out = y + b_ref[...]                                     # bias + activation in f32
        if apply_relu:
            out = jnp.maximum(out, 0.0)
        o_ref[...] = out.astype(o_ref.dtype)


# ----------------------------------------------------------------------------- wrapper
def _gcn_layer(a_p, h_p, w_p, b_p, *, tile_m, tile_k, apply_relu, out_dtype):
    n_pad = a_p.shape[0]
    c_pad = w_p.shape[1]
    kernel = functools.partial(gcn_layer_kernel, tile_k=tile_k, apply_relu=apply_relu)
    return pl.pallas_call(
        kernel,
        out_shape=jax.ShapeDtypeStruct((n_pad, c_pad), out_dtype),
        grid_spec=pltpu.PrefetchScalarGridSpec(
            num_scalar_prefetch=0,
            grid=(n_pad // tile_m, n_pad // tile_k),
            in_specs=[
                pl.BlockSpec((tile_m, tile_k), lambda i, k: (i, k)),   # A_hat: streamed tiles
                pl.BlockSpec((n_pad, c_pad), lambda i, k: (0, 0)),     # H: resident, 1 DMA
                pl.BlockSpec((c_pad, c_pad), lambda i, k: (0, 0)),     # W: resident (32 KiB)
                pl.BlockSpec((1, c_pad), lambda i, k: (0, 0)),         # bias: resident
            ],
            out_specs=pl.BlockSpec((tile_m, c_pad), lambda i, k: (i, 0)),
            scratch_shapes=[pltpu.VMEM((tile_m, c_pad), jnp.float32)],
        ),
        compiler_params=pltpu.CompilerParams(
            dimension_semantics=("parallel", "arbitrary"),
            vmem_limit_bytes=_VMEM_LIMIT),
    )(a_p, h_p, w_p, b_p)


# ----------------------------------------------------------------------------- glue
def build_normalized_adjacency(edge_index, num_nodes, edge_weight=None):
    """Dense GCN normalization A_hat[t, s] = d^-1/2[t] (A+I)[s,t] d^-1/2[s] (PyG gcn_norm)."""
    src, dst = edge_index[0], edge_index[1]
    w = (jnp.ones(src.shape[0], jnp.float32) if edge_weight is None
         else edge_weight.astype(jnp.float32))
    adj = jnp.zeros((num_nodes, num_nodes), jnp.float32).at[src, dst].add(w)
    adj = adj + jnp.eye(num_nodes, dtype=jnp.float32)          # self loops (fill_value=1)
    deg = adj.sum(axis=0)                                      # in-degree incl. self loops
    dinv = jnp.where(deg > 0, jax.lax.rsqrt(jnp.where(deg > 0, deg, 1.0)), 0.0)
    return dinv[:, None] * adj.T * dinv[None, :]


def prepare_static(a_hat, weights, biases):
    """Pad / cast everything that depends only on the static graph + parameters.

    Zero padding is exact: padded A_hat rows/columns are zero so padded nodes never feed
    real nodes, and padded channel columns stay zero through matmul / bias / ReLU; they are
    sliced off at the end of the forward pass.
    """
    n = a_hat.shape[0]
    n_pad = _round_up(max(n, 128), 128)
    c_pad = _round_up(max([w.shape[0] for w in weights] + [w.shape[1] for w in weights]),
                      LANE)
    tile_m, tile_k = _pick_tiles(n_pad)

    a_p = (jnp.zeros((n_pad, n_pad), jnp.float32).at[:n, :n].set(a_hat)
           .astype(jnp.bfloat16))
    w_ps, b_ps = [], []
    for w, b in zip(weights, biases):
        cin, cout = w.shape
        w_ps.append(jnp.zeros((c_pad, c_pad), jnp.float32)
                    .at[:cin, :cout].set(w).astype(jnp.bfloat16))
        b_ps.append(jnp.zeros((1, c_pad), jnp.float32).at[0, :cout].set(b))
    return a_p, w_ps, b_ps, dict(n_pad=n_pad, c_pad=c_pad, tile_m=tile_m, tile_k=tile_k)


def gcn_classification(x, a_p, w_ps, b_ps, *, out_dim, n_pad, c_pad, tile_m, tile_k):
    """Forward pass. x: (N, C0) f32; a_p/w_ps/b_ps: pre-padded static operands."""
    n, c0 = x.shape
    h = jnp.zeros((n_pad, c_pad), jnp.float32).at[:n, :c0].set(x).astype(jnp.bfloat16)
    num_layers = len(w_ps)
    for l, (w_p, b_p) in enumerate(zip(w_ps, b_ps)):
        last = l == num_layers - 1
        h = _gcn_layer(a_p, h, w_p, b_p, tile_m=tile_m, tile_k=tile_k,
                       apply_relu=not last,
                       out_dtype=jnp.float32 if last else jnp.bfloat16)
    return h[:n, :out_dim]


def reference_forward(x, a_hat, weights, biases):
    """Pure-JAX f32 reference mirroring the same math (correctness check)."""
    h = x
    for l, (w, b) in enumerate(zip(weights, biases)):
        h = a_hat @ (h @ w) + b[None, :]
        if l < len(weights) - 1:
            h = jax.nn.relu(h)
    return h


if __name__ == "__main__":
    key = jax.random.PRNGKey(0)
    num_channels = [8, 32, 4]        # GCNConv(8->32) -> ReLU -> GCNConv(32->4)
    N = 384                          # 3 row tiles + 3 k tiles -> exercises accumulation
                                     # and keeps >= 2 "parallel" row tiles for v7x

    num_layers = len(num_channels) - 1
    keys = jax.random.split(key, 1 + 2 * num_layers)

    x = jax.random.normal(keys[0], (N, num_channels[0]), jnp.float32)

    # Small deterministic directed graph: ring edges (both directions) + skip edges.
    idx = jnp.arange(N, dtype=jnp.int32)
    src = jnp.concatenate([idx, (idx + 1) % N, idx])
    dst = jnp.concatenate([(idx + 1) % N, idx, (idx + 5) % N])
    edge_index = jnp.stack([src, dst]).astype(jnp.int32)      # (2, 3N)

    def glorot(k, shape):
        lim = (6.0 / (shape[0] + shape[1])) ** 0.5
        return jax.random.uniform(k, shape, jnp.float32, -lim, lim)

    weights, biases = [], []
    for l in range(num_layers):
        weights.append(glorot(keys[1 + 2 * l], (num_channels[l], num_channels[l + 1])))
        biases.append(jax.random.uniform(keys[2 + 2 * l],
                                         (num_channels[l + 1],), jnp.float32, -0.1, 0.1))

    # Static graph/parameter preprocessing hoisted out of the per-forward path.
    a_hat = build_normalized_adjacency(edge_index, N)
    a_p, w_ps, b_ps, cfg = prepare_static(a_hat, weights, biases)

    forward = jax.jit(functools.partial(gcn_classification,
                                        out_dim=num_channels[-1], **cfg))
    out = forward(x, a_p, w_ps, b_ps)
    out = jax.block_until_ready(out)
    assert out.shape == (N, num_channels[-1])

    ref = reference_forward(x, a_hat, weights, biases)
    # bf16 MXU operands vs. f32 reference -> loosened tolerance.
    np.testing.assert_allclose(np.asarray(out), np.asarray(ref), rtol=5e-2, atol=5e-2)

    print("KERNEL_OK")
</pallas_src>

<mosaic_0001>
module attributes {stable_mosaic.version = 11 : i64} {
  func.func @gcn_layer_kernel(%arg0: i32, %arg1: i32, %arg2: memref<128x128xbf16, #tpu.memory_space<vmem>>, %arg3: memref<384x128xbf16, #tpu.memory_space<vmem>>, %arg4: memref<128x128xbf16, #tpu.memory_space<vmem>>, %arg5: memref<1x128xf32, #tpu.memory_space<vmem>>, %arg6: memref<128x128xf32, #tpu.memory_space<vmem>>, %arg7: memref<128x128xf32, #tpu.memory_space<vmem>>) attributes {dimension_semantics = [#tpu.dimension_semantics<parallel>, #tpu.dimension_semantics<arbitrary>], iteration_bounds = array<i64: 3, 3>, scalar_prefetch = 0 : i64, scratch_operands = 1 : i64, tpu.core_type = #tpu.core_type<tc>, window_params = [{transform_indices = @transform_0, window_bounds = array<i64: 128, 128>}, {pipeline_mode = #tpu.pipeline_mode<synchronous>, transform_indices = @transform_1, window_bounds = array<i64: 384, 128>}, {pipeline_mode = #tpu.pipeline_mode<synchronous>, transform_indices = @transform_2, window_bounds = array<i64: 128, 128>}, {pipeline_mode = #tpu.pipeline_mode<synchronous>, transform_indices = @transform_3, window_bounds = array<i64: 1, 128>}, {transform_indices = @transform_4, window_bounds = array<i64: 128, 128>}]} {
    %c128_i32 = arith.constant 128 : i32
    %0 = arith.muli %arg1, %c128_i32 : i32
    %1 = tpu.assume_multiple %0, 128 : i32
    %2 = arith.index_cast %1 : i32 to index
    %c0 = arith.constant 0 : index
    %3 = vector.load %arg3[%2, %c0] : memref<384x128xbf16, #tpu.memory_space<vmem>>, vector<128x128xbf16>
    %c0_0 = arith.constant 0 : index
    %c0_1 = arith.constant 0 : index
    %4 = vector.load %arg2[%c0_0, %c0_1] : memref<128x128xbf16, #tpu.memory_space<vmem>>, vector<128x128xbf16>
    %cst = arith.constant dense<0.000000e+00> : vector<128x128xf32>
    %5 = tpu.matmul %4, %3, %cst {dimension_numbers = #tpu.dot_dimension_numbers<[1], [0], [0], [1], [0, 0, 1, 1], [], []>} : vector<128x128xbf16>, vector<128x128xbf16>, vector<128x128xf32> -> vector<128x128xf32>
    %c0_i32 = arith.constant 0 : i32
    %6 = arith.cmpi eq, %arg1, %c0_i32 : i32
    %7 = arith.extui %6 : i1 to i32
    %c0_i32_2 = arith.constant 0 : i32
    %8 = arith.cmpi ne, %7, %c0_i32_2 : i32
    scf.if %8 {
      %c0_6 = arith.constant 0 : index
      %c0_7 = arith.constant 0 : index
      %15 = vector.load %arg7[%c0_6, %c0_7] : memref<128x128xf32, #tpu.memory_space<vmem>>, vector<128x128xf32>
      tpu.vector_store %arg7[%c0_6, %c0_7], %5 {strides = array<i32>} : memref<128x128xf32, #tpu.memory_space<vmem>>, vector<128x128xf32>,
    } else {
    }
    %c0_i32_3 = arith.constant 0 : i32
    %9 = arith.cmpi sgt, %arg1, %c0_i32_3 : i32
    %10 = arith.extui %9 : i1 to i32
    %c0_i32_4 = arith.constant 0 : i32
    %11 = arith.cmpi ne, %10, %c0_i32_4 : i32
    scf.if %11 {
      %c0_6 = arith.constant 0 : index
      %c0_7 = arith.constant 0 : index
      %15 = vector.load %arg7[%c0_6, %c0_7] : memref<128x128xf32, #tpu.memory_space<vmem>>, vector<128x128xf32>
      %16 = arith.addf %15, %5 : vector<128x128xf32>
      %c0_8 = arith.constant 0 : index
      %c0_9 = arith.constant 0 : index
      %17 = vector.load %arg7[%c0_8, %c0_9] : memref<128x128xf32, #tpu.memory_space<vmem>>, vector<128x128xf32>
      tpu.vector_store %arg7[%c0_8, %c0_9], %16 {strides = array<i32>} : memref<128x128xf32, #tpu.memory_space<vmem>>, vector<128x128xf32>,
    } else {
    }
    %c2_i32 = arith.constant 2 : i32
    %12 = arith.cmpi eq, %arg1, %c2_i32 : i32
    %13 = arith.extui %12 : i1 to i32
    %c0_i32_5 = arith.constant 0 : i32
    %14 = arith.cmpi ne, %13, %c0_i32_5 : i32
    scf.if %14 {
      %c0_6 = arith.constant 0 : index
      %c0_7 = arith.constant 0 : index
      %15 = vector.load %arg7[%c0_6, %c0_7] : memref<128x128xf32, #tpu.memory_space<vmem>>, vector<128x128xf32>
      %16 = arith.truncf %15 : vector<128x128xf32> to vector<128x128xbf16>
      %c0_8 = arith.constant 0 : index
      %c0_9 = arith.constant 0 : index
      %17 = vector.load %arg4[%c0_8, %c0_9] : memref<128x128xbf16, #tpu.memory_space<vmem>>, vector<128x128xbf16>
      %cst_10 = arith.constant dense<0.000000e+00> : vector<128x128xf32>
      %18 = tpu.matmul %16, %17, %cst_10 {dimension_numbers = #tpu.dot_dimension_numbers<[1], [0], [0], [1], [0, 0, 1, 1], [], []>} : vector<128x128xbf16>, vector<128x128xbf16>, vector<128x128xf32> -> vector<128x128xf32>
      %c0_11 = arith.constant 0 : index
      %c0_12 = arith.constant 0 : index
      %19 = vector.load %arg5[%c0_11, %c0_12] : memref<1x128xf32, #tpu.memory_space<vmem>>, vector<1x128xf32>
      %20 = vector.broadcast %19 : vector<1x128xf32> to vector<128x128xf32>
      %21 = arith.addf %18, %20 : vector<128x128xf32>
      %c0_13 = arith.constant 0 : index
      %c0_14 = arith.constant 0 : index
      %22 = vector.load %arg6[%c0_13, %c0_14] : memref<128x128xf32, #tpu.memory_space<vmem>>, vector<128x128xf32>
      tpu.vector_store %arg6[%c0_13, %c0_14], %21 {strides = array<i32>} : memref<128x128xf32, #tpu.memory_space<vmem>>, vector<128x128xf32>,
    } else {
    }
    return
  }
  func.func @transform_0(%arg0: i32, %arg1: i32) -> (i32, i32) {
    %c0_i32 = arith.constant 0 : i32
    return %arg0, %arg1 : i32, i32
  }
  func.func @transform_1(%arg0: i32, %arg1: i32) -> (i32, i32) {
    %c0_i32 = arith.constant 0 : i32
    %c0_i32_0 = arith.constant 0 : i32
    %c0_i32_1 = arith.constant 0 : i32
    return %c0_i32, %c0_i32_0 : i32, i32
  }
  func.func @transform_2(%arg0: i32, %arg1: i32) -> (i32, i32) {
    %c0_i32 = arith.constant 0 : i32
    %c0_i32_0 = arith.constant 0 : i32
    %c0_i32_1 = arith.constant 0 : i32
    return %c0_i32, %c0_i32_0 : i32, i32
  }
  func.func @transform_3(%arg0: i32, %arg1: i32) -> (i32, i32) {
    %c0_i32 = arith.constant 0 : i32
    %c0_i32_0 = arith.constant 0 : i32
    %c0_i32_1 = arith.constant 0 : i32
    return %c0_i32, %c0_i32_0 : i32, i32
  }
  func.func @transform_4(%arg0: i32, %arg1: i32) -> (i32, i32) {
    %c0_i32 = arith.constant 0 : i32
    %c0_i32_0 = arith.constant 0 : i32
    return %arg0, %c0_i32 : i32, i32
  }
}

module attributes {stable_mosaic.version = 11 : i64} {
  func.func @gcn_layer_kernel(%arg0: i32, %arg1: i32, %arg2: memref<128x128xbf16, #tpu.memory_space<vmem>>, %arg3: memref<384x128xbf16, #tpu.memory_space<vmem>>, %arg4: memref<128x128xbf16, #tpu.memory_space<vmem>>, %arg5: memref<1x128xf32, #tpu.memory_space<vmem>>, %arg6: memref<128x128xbf16, #tpu.memory_space<vmem>>, %arg7: memref<128x128xf32, #tpu.memory_space<vmem>>) attributes {dimension_semantics = [#tpu.dimension_semantics<parallel>, #tpu.dimension_semantics<arbitrary>], iteration_bounds = array<i64: 3, 3>, scalar_prefetch = 0 : i64, scratch_operands = 1 : i64, tpu.core_type = #tpu.core_type<tc>, window_params = [{transform_indices = @transform_0, window_bounds = array<i64: 128, 128>}, {pipeline_mode = #tpu.pipeline_mode<synchronous>, transform_indices = @transform_1, window_bounds = array<i64: 384, 128>}, {pipeline_mode = #tpu.pipeline_mode<synchronous>, transform_indices = @transform_2, window_bounds = array<i64: 128, 128>}, {pipeline_mode = #tpu.pipeline_mode<synchronous>, transform_indices = @transform_3, window_bounds = array<i64: 1, 128>}, {transform_indices = @transform_4, window_bounds = array<i64: 128, 128>}]} {
    %c128_i32 = arith.constant 128 : i32
    %0 = arith.muli %arg1, %c128_i32 : i32
    %1 = tpu.assume_multiple %0, 128 : i32
    %2 = arith.index_cast %1 : i32 to index
    %c0 = arith.constant 0 : index
    %3 = vector.load %arg3[%2, %c0] : memref<384x128xbf16, #tpu.memory_space<vmem>>, vector<128x128xbf16>
    %c0_0 = arith.constant 0 : index
    %c0_1 = arith.constant 0 : index
    %4 = vector.load %arg2[%c0_0, %c0_1] : memref<128x128xbf16, #tpu.memory_space<vmem>>, vector<128x128xbf16>
    %cst = arith.constant dense<0.000000e+00> : vector<128x128xf32>
    %5 = tpu.matmul %4, %3, %cst {dimension_numbers = #tpu.dot_dimension_numbers<[1], [0], [0], [1], [0, 0, 1, 1], [], []>} : vector<128x128xbf16>, vector<128x128xbf16>, vector<128x128xf32> -> vector<128x128xf32>
    %c0_i32 = arith.constant 0 : i32
    %6 = arith.cmpi eq, %arg1, %c0_i32 : i32
    %7 = arith.extui %6 : i1 to i32
    %c0_i32_2 = arith.constant 0 : i32
    %8 = arith.cmpi ne, %7, %c0_i32_2 : i32
    scf.if %8 {
      %c0_6 = arith.constant 0 : index
      %c0_7 = arith.constant 0 : index
      %15 = vector.load %arg7[%c0_6, %c0_7] : memref<128x128xf32, #tpu.memory_space<vmem>>, vector<128x128xf32>
      tpu.vector_store %arg7[%c0_6, %c0_7], %5 {strides = array<i32>} : memref<128x128xf32, #tpu.memory_space<vmem>>, vector<128x128xf32>,
    } else {
    }
    %c0_i32_3 = arith.constant 0 : i32
    %9 = arith.cmpi sgt, %arg1, %c0_i32_3 : i32
    %10 = arith.extui %9 : i1 to i32
    %c0_i32_4 = arith.constant 0 : i32
    %11 = arith.cmpi ne, %10, %c0_i32_4 : i32
    scf.if %11 {
      %c0_6 = arith.constant 0 : index
      %c0_7 = arith.constant 0 : index
      %15 = vector.load %arg7[%c0_6, %c0_7] : memref<128x128xf32, #tpu.memory_space<vmem>>, vector<128x128xf32>
      %16 = arith.addf %15, %5 : vector<128x128xf32>
      %c0_8 = arith.constant 0 : index
      %c0_9 = arith.constant 0 : index
      %17 = vector.load %arg7[%c0_8, %c0_9] : memref<128x128xf32, #tpu.memory_space<vmem>>, vector<128x128xf32>
      tpu.vector_store %arg7[%c0_8, %c0_9], %16 {strides = array<i32>} : memref<128x128xf32, #tpu.memory_space<vmem>>, vector<128x128xf32>,
    } else {
    }
    %c2_i32 = arith.constant 2 : i32
    %12 = arith.cmpi eq, %arg1, %c2_i32 : i32
    %13 = arith.extui %12 : i1 to i32
    %c0_i32_5 = arith.constant 0 : i32
    %14 = arith.cmpi ne, %13, %c0_i32_5 : i32
    scf.if %14 {
      %c0_6 = arith.constant 0 : index
      %c0_7 = arith.constant 0 : index
      %15 = vector.load %arg7[%c0_6, %c0_7] : memref<128x128xf32, #tpu.memory_space<vmem>>, vector<128x128xf32>
      %16 = arith.truncf %15 : vector<128x128xf32> to vector<128x128xbf16>
      %c0_8 = arith.constant 0 : index
      %c0_9 = arith.constant 0 : index
      %17 = vector.load %arg4[%c0_8, %c0_9] : memref<128x128xbf16, #tpu.memory_space<vmem>>, vector<128x128xbf16>
      %cst_10 = arith.constant dense<0.000000e+00> : vector<128x128xf32>
      %18 = tpu.matmul %16, %17, %cst_10 {dimension_numbers = #tpu.dot_dimension_numbers<[1], [0], [0], [1], [0, 0, 1, 1], [], []>} : vector<128x128xbf16>, vector<128x128xbf16>, vector<128x128xf32> -> vector<128x128xf32>
      %c0_11 = arith.constant 0 : index
      %c0_12 = arith.constant 0 : index
      %19 = vector.load %arg5[%c0_11, %c0_12] : memref<1x128xf32, #tpu.memory_space<vmem>>, vector<1x128xf32>
      %20 = vector.broadcast %19 : vector<1x128xf32> to vector<128x128xf32>
      %21 = arith.addf %18, %20 : vector<128x128xf32>
      %cst_13 = arith.constant 0.000000e+00 : f32
      %22 = vector.broadcast %cst_13 : f32 to vector<128x128xf32>
      %23 = arith.maximumf %21, %22 : vector<128x128xf32>
      %24 = arith.truncf %23 : vector<128x128xf32> to vector<128x128xbf16>
      %c0_14 = arith.constant 0 : index
      %c0_15 = arith.constant 0 : index
      %25 = vector.load %arg6[%c0_14, %c0_15] : memref<128x128xbf16, #tpu.memory_space<vmem>>, vector<128x128xbf16>
      tpu.vector_store %arg6[%c0_14, %c0_15], %24 {strides = array<i32>} : memref<128x128xbf16, #tpu.memory_space<vmem>>, vector<128x128xbf16>,
    } else {
    }
    return
  }
  func.func @transform_0(%arg0: i32, %arg1: i32) -> (i32, i32) {
    %c0_i32 = arith.constant 0 : i32
    return %arg0, %arg1 : i32, i32
  }
  func.func @transform_1(%arg0: i32, %arg1: i32) -> (i32, i32) {
    %c0_i32 = arith.constant 0 : i32
    %c0_i32_0 = arith.constant 0 : i32
    %c0_i32_1 = arith.constant 0 : i32
    return %c0_i32, %c0_i32_0 : i32, i32
  }
  func.func @transform_2(%arg0: i32, %arg1: i32) -> (i32, i32) {
    %c0_i32 = arith.constant 0 : i32
    %c0_i32_0 = arith.constant 0 : i32
    %c0_i32_1 = arith.constant 0 : i32
    return %c0_i32, %c0_i32_0 : i32, i32
  }
  func.func @transform_3(%arg0: i32, %arg1: i32) -> (i32, i32) {
    %c0_i32 = arith.constant 0 : i32
    %c0_i32_0 = arith.constant 0 : i32
    %c0_i32_1 = arith.constant 0 : i32
    return %c0_i32, %c0_i32_0 : i32, i32
  }
  func.func @transform_4(%arg0: i32, %arg1: i32) -> (i32, i32) {
    %c0_i32 = arith.constant 0 : i32
    %c0_i32_0 = arith.constant 0 : i32
    return %arg0, %c0_i32 : i32, i32
  }
}

</mosaic_0001>

<bundles_post_ra>
// kernel: gcn_classification.2
= control target key start
LH: loop header
LB: loop body
LE: loop exit
PB: predicated region body
PF: predicated region fallthrough
CT: control target
= control target key end

     0   :  { %9 = vsyncpa [#allocation5], 0  ;;  %s1299_s15 = smov 0   ;;  %s1301_s16 = smov 0   ;;  %s1489_s0 = inlined_call_operand.vmem [shape: bf16[384,384], index: 0, kind: input, shape index: {}]   ;;  %s1490_s1 = inlined_call_operand.vmem [shape: bf16[384,128], index: 1, kind: input, shape index: {}]   ;;  %s1491_s2 = inlined_call_operand.hbm [shape: bf16[128,128], index: 2, kind: input, shape index: {}]   ;;  %s1492_s3 = inlined_call_operand.vmem [shape: f32[1,128], index: 3, kind: input, shape index: {}]   ;;  %s1493_s4 = inlined_call_operand.vmem [shape: bf16[384,128], index: 4, kind: output, shape index: {}]  }
   0x1   :  { %s1303_s17 = smov 0   ;;  %s1305_s18 = smov 0  }
   0x2   :  { %s1307_s19 = smov 0   ;;  %s1309_s20 = smov 0  }
   0x3   :  { %s1311_s21 = smov 0  }
   0x4 LB: > { %s874_s22 = sadd.s32 4294967295, %s1269_s21   ;;  %s24_s23 = sadd.s32 1, %s1261_s19  ;;  %s1269_s21 = sphi %s1311_s21, %s15_s21   ;;  %s1265_s20 = sphi %s1309_s20, %s1502_s20   ;;  %s1261_s19 = sphi %s1307_s19, %s1501_s19   ;;  %s1257_s18 = sphi %s1305_s18, %s1500_s18   ;;  %s1253_s17 = sphi %s1303_s17, %s1499_s17   ;;  %s1249_s16 = sphi %s1301_s16, %s1498_s16   ;;  %s1245_s15 = sphi %s1299_s15, %s1497_s15  }
   0x5   : > { %p25_p0 = scmp.ge.s32.totalorder %s24_s23, 3  ;;  %s27_s24 = sadd.s32 1, %s1265_s20 }
   0x6   : > { %s36_s25 = sadd.s32 1, %s1249_s16  ;;  %p43_p1 = scmp.ne.s32.totalorder %s1249_s16, %s1245_s15 }
   0x7   : > { %s1504_s23 = smov (%p25_p0, %s24_s23), 0  ;;  %s1506_s24 = smov (!%p25_p0, %s27_s24), %s1265_s20 }
   0x8   : > { %s32_s26 = ssub.s32 %s1261_s19, %s1504_s23  ;;  %p44_p2 = scmp.eq.s32.totalorder %s1269_s21, 0 }
   0x9   : > { %p29_p3 = scmp.ge.s32.totalorder %s1506_s24, 3  ;;  %p876_p4 = scmp.ge.s32.totalorder %s1269_s21, 1 }
   0xa   : > { %p1347_p5 = por %p44_p2, %p43_p1  ;;  %p149_p6 = scmp.lt.s32.totalorder %s1269_s21, 10 }
   0xb   : > { %s1508_s24 = smov (%p29_p3, %s1506_s24), 0  ;;  %p1360_p8 = scmp.eq.s32.totalorder %s874_s22, 0 }
   0xc   : > { %p1354_p7 = pnand %p876_p4, %p149_p6  ;;  %s31_s29 = ssub.s32 %s1265_s20, %s1508_s24 }
   0xd   : > { %s33_s5 = sor.u32 %s32_s26, %s31_s29  ;;  %s163_s8 = sshll.u32 %s1491_s2, 4  ;;  %s164_s8 = int_to_ptr.hbm [resolvable:$true] %s163_s8 }
   0xe   : > { %p1115_p9 = pneg %p1354_p7  ;;  %p34_p10 = scmp.eq.s32.totalorder %s33_s5, 0 }
   0xf   : > { %s1271_s10 = smov [#allocation4]   ;;  %s1272_s12 = smov 64  }
  0x10   : > { %s1370_s9 = scalar_select %p34_p10, %s1249_s16, %s36_s25  }
  0x11   : > { %s165_s11 = sshll.u32 %s1271_s10, 4  ;;  %p1116_p11 = pnand %p1360_p8, %p1115_p9  ;;  %s166_s11 = int_to_ptr.vmem [resolvable:$true] %s165_s11 }
  0x12   : > { %s1273_s13 = smov 4   ;;  %p878_p12 = scmp.ge.s32.totalorder %s1269_s21, 9 }
  0x13   : > { %1118 = dma.hbm_to_vmem [thread:$0]  (!%p1116_p11), %s164_s8, 1024, %s166_s11, [#allocation5], %s1272_s12, %s1272_s12, %s1273_s13  }
  0x14   : > { %178 = sbr.rel (%p878_p12) target bundleno = 48 (0x30), region = 28 }
  0x19   : > { %181 = sbr.rel (!%p1347_p5) target bundleno = 48 (0x30), region = 32  ;;  %s183_s14 = sand.u32 (%p1347_p5), 1, %s1249_s16  }
  0x1a   : > { %s1110_s22 = smul.u32 (%p1347_p5), 48, %s1265_s20  ;;  %s879_s25 = sshll.u32 (%p1347_p5), %s183_s14, 6 }
  0x1b   : > { %s185_s27 = scalar_lea.vmem (%p1347_p5), [#allocation3], %s879_s25 }
  0x1c   : > { %s188_s26 = sadd.s32 (%p1347_p5), %s1261_s19, %s1110_s22 }
  0x1d   : > { %s882_s29 = sshll.u32 (%p1347_p5), %s188_s26, 2 }
  0x1e   : > { %s1383_s7 = scalar_lea.vmem %s1489_s0, %s882_s29 }
  0x1f   : > { %v207_v0 = vld [vmem:[%s1383_s7] sm:$0xf]  ;;  %v209_v1 = vld [vmem:[%s1383_s7 + $0xc] sm:$0xf]  ;;  %v211_v2 = vld [vmem:[%s1383_s7 + $0x18] sm:$0xf] }
  0x20   : > { %208 = vst [vmem:[%s185_s27] sm:$0xf] %v207_v0  ;;  %v213_v3 = vld [vmem:[%s1383_s7 + $0x24] sm:$0xf]  ;;  %v215_v4 = vld [vmem:[%s1383_s7 + $0x30] sm:$0xf] }
  0x21   : > { %210 = vst [vmem:[%s185_s27 + $0x4] sm:$0xf] %v209_v1  ;;  %v217_v5 = vld [vmem:[%s1383_s7 + $0x3c] sm:$0xf]  ;;  %v219_v6 = vld [vmem:[%s1383_s7 + $0x48] sm:$0xf] }
  0x22   : > { %212 = vst [vmem:[%s185_s27 + $0x8] sm:$0xf] %v211_v2  ;;  %v221_v7 = vld [vmem:[%s1383_s7 + $0x54] sm:$0xf]  ;;  %v223_v8 = vld [vmem:[%s1383_s7 + $0x60] sm:$0xf] }
  0x23   : > { %214 = vst [vmem:[%s185_s27 + $0xc] sm:$0xf] %v213_v3  ;;  %v225_v9 = vld [vmem:[%s1383_s7 + $0x6c] sm:$0xf]  ;;  %v227_v10 = vld [vmem:[%s1383_s7 + $0x78] sm:$0xf] }
  0x24   : > { %216 = vst [vmem:[%s185_s27 + $0x10] sm:$0xf] %v215_v4  ;;  %v229_v11 = vld [vmem:[%s1383_s7 + $0x84] sm:$0xf]  ;;  %v231_v12 = vld [vmem:[%s1383_s7 + $0x90] sm:$0xf] }
  0x25   : > { %218 = vst [vmem:[%s185_s27 + $0x14] sm:$0xf] %v217_v5  ;;  %v233_v13 = vld [vmem:[%s1383_s7 + $0x9c] sm:$0xf]  ;;  %v235_v14 = vld [vmem:[%s1383_s7 + $0xa8] sm:$0xf] }
  0x26   : > { %220 = vst [vmem:[%s185_s27 + $0x18] sm:$0xf] %v219_v6  ;;  %v237_v15 = vld [vmem:[%s1383_s7 + $0xb4] sm:$0xf] }
  0x27   : > { %222 = vst [vmem:[%s185_s27 + $0x1c] sm:$0xf] %v221_v7 }
  0x28   : > { %224 = vst [vmem:[%s185_s27 + $0x20] sm:$0xf] %v223_v8 }
  0x29   : > { %226 = vst [vmem:[%s185_s27 + $0x24] sm:$0xf] %v225_v9 }
  0x2a   : > { %228 = vst [vmem:[%s185_s27 + $0x28] sm:$0xf] %v227_v10 }
  0x2b   : > { %230 = vst [vmem:[%s185_s27 + $0x2c] sm:$0xf] %v229_v11 }
  0x2c   : > { %232 = vst [vmem:[%s185_s27 + $0x30] sm:$0xf] %v231_v12 }
  0x2d   : > { %234 = vst [vmem:[%s185_s27 + $0x34] sm:$0xf] %v233_v13 }
  0x2e   : > { %236 = vst [vmem:[%s185_s27 + $0x38] sm:$0xf] %v235_v14 }
  0x2f   : > { %238 = vst [vmem:[%s185_s27 + $0x3c] sm:$0xf] %v237_v15 }
  0x30 PF: > { %297 = sbr.rel (%p1354_p7) target bundleno = 493 (0x1ed), region = 73  ;;  %s300_s8 = sand.u32 (!%p1354_p7), 1, %s1245_s15  }
  0x31   : > { %s884_s10 = sshll.u32 (!%p1354_p7), %s300_s8, 6 }
  0x32   : > { %s1404_s11 = scalar_lea.vmem (!%p1354_p7), [#allocation3], %s884_s10 }
  0x35   : > { %1240 = dma.done.wait (%p1360_p8), [#allocation5], 1024  }
  0x36   : > { %1242 = vsyncadd (%p1360_p8), [#allocation5], 4294966272  ;;  %s886_s12 = sshll.u32 %s1257_s18, 4  ;;  %s888_s13 = sshll.u32 %s1253_s17, 7  ;;  %v999_v24 = vld [vmem:[%s1404_s11] sm:$0xff]  ;;  %v1001_v25 = vld [vmem:[%s1404_s11 + $0x10] sm:$0xff] }
  0x37   : > { %p332_p13 = scmp.lt.s32.totalorder %s886_s12, 47  ;;  %s338_s14 = sshra.s32 %s888_s13, 3  ;;  %v1003_v26 = vld [vmem:[%s1404_s11 + $0x20] sm:$0xff]  ;;  %v1005_v27 = vld [vmem:[%s1404_s11 + $0x30] sm:$0xff]  ;;  %v1000_v28 = vld [vmem:[%s1404_s11 + $0x8] sm:$0xff] }
  0x38   : > { %s889_s22 = sshll.u32 %s338_s14, 2  ;;  %v1002_v29 = vld [vmem:[%s1404_s11 + $0x18] sm:$0xff]  ;;  %v1004_v30 = vld [vmem:[%s1404_s11 + $0x28] sm:$0xff]  ;;  %p954_p0 = scmp.ne.s32.totalorder %s1253_s17, 0 }
  0x39   : > { %s1510_s12 = smov (!%p332_p13, %s886_s12), 47  ;;  %s1415_s15 = scalar_lea.vmem %s1490_s1, %s889_s22  ;;  %v1006_v31 = vld [vmem:[%s1404_s11 + $0x38] sm:$0xff] }
  0x3a   : > { %s887_s26 = sshll.u32 %s1510_s12, 2  ;;  %v998_v16 = vld [vmem:[%s1415_s15 + $0x38] sm:$0xff]  ;;  %v997_v17 = vld [vmem:[%s1415_s15 + $0x30] sm:$0xff]  ;;  %v996_v18 = vld [vmem:[%s1415_s15 + $0x28] sm:$0xff] }
  0x3b   : > { %s1420_s5 = scalar_lea.vmem %s1493_s4, %s887_s26  ;;  %470 = vmatpush.bf16.msra.mxu0 %v998_v16  ;;  %1062 = vmatpush.bf16.msra.mxu1 %v998_v16  ;;  %v995_v19 = vld [vmem:[%s1415_s15 + $0x20] sm:$0xff]  ;;  %v994_v20 = vld [vmem:[%s1415_s15 + $0x18] sm:$0xff]  ;;  %v993_v21 = vld [vmem:[%s1415_s15 + $0x10] sm:$0xff] }
  0x3c   : > { %1063 = vmatpush.bf16.msra.mxu2 %v998_v16  ;;  %1064 = vmatpush.bf16.msra.mxu3 %v998_v16  ;;  %v992_v22 = vld [vmem:[%s1415_s15 + $0x8] sm:$0xff]  ;;  %v991_v23 = vld [vmem:[%s1415_s15] sm:$0xff] }
  0x3f   : > { %471 = vmatpush.bf16.msra.mxu0 %v997_v17  ;;  %1065 = vmatpush.bf16.msra.mxu1 %v997_v17 }
  0x40   : > { %1066 = vmatpush.bf16.msra.mxu2 %v997_v17  ;;  %1067 = vmatpush.bf16.msra.mxu3 %v997_v17 }
  0x43   : > { %472 = vmatpush.bf16.msra.mxu0 %v996_v18  ;;  %1068 = vmatpush.bf16.msra.mxu1 %v996_v18 }
  0x44   : > { %1069 = vmatpush.bf16.msra.mxu2 %v996_v18  ;;  %1070 = vmatpush.bf16.msra.mxu3 %v996_v18 }
  0x47   : > { %473 = vmatpush.bf16.msra.mxu0 %v995_v19  ;;  %1071 = vmatpush.bf16.msra.mxu1 %v995_v19 }
  0x48   : > { %1072 = vmatpush.bf16.msra.mxu2 %v995_v19  ;;  %1073 = vmatpush.bf16.msra.mxu3 %v995_v19 }
  0x4b   : > { %474 = vmatpush.bf16.msra.mxu0 %v994_v20  ;;  %1074 = vmatpush.bf16.msra.mxu1 %v994_v20 }
  0x4c   : > { %1075 = vmatpush.bf16.msra.mxu2 %v994_v20  ;;  %1076 = vmatpush.bf16.msra.mxu3 %v994_v20 }
  0x4f   : > { %475 = vmatpush.bf16.msra.mxu0 %v993_v21  ;;  %1077 = vmatpush.bf16.msra.mxu1 %v993_v21 }
  0x50   : > { %1078 = vmatpush.bf16.msra.mxu2 %v993_v21  ;;  %1079 = vmatpush.bf16.msra.mxu3 %v993_v21 }
  0x53   : > { %476 = vmatpush.bf16.msra.mxu0 %v992_v22  ;;  %1080 = vmatpush.bf16.msra.mxu1 %v992_v22 }
  0x54   : > { %1081 = vmatpush.bf16.msra.mxu2 %v992_v22  ;;  %1082 = vmatpush.bf16.msra.mxu3 %v992_v22 }
  0x57   : > { %477 = vmatpush.bf16.msra.mxu0 %v991_v23  ;;  %1083 = vmatpush.bf16.msra.mxu1 %v991_v23 }
  0x58   : > { %1084 = vmatpush.bf16.msra.mxu2 %v991_v23  ;;  %1085 = vmatpush.bf16.msra.mxu3 %v991_v23 }
  0x5a   : > { %478 = vmatmul.bf16.vlgmr.msra.gmra.mxu0 %v999_v24  ;;  %488 = vmatmul.bf16.vlgmr.msra.gmra.mxu1 %v1001_v25 }
  0x5b   : > { %498 = vmatmul.bf16.vlgmr.msra.gmra.mxu2 %v1003_v26  ;;  %508 = vmatmul.bf16.vlgmr.msra.gmra.mxu3 %v1005_v27 }
  0x6a   : > { %483 = vmatmul.bf16.gmra.mxu0 %v1000_v28  ;;  %493 = vmatmul.bf16.gmra.mxu1 %v1002_v29 }
  0x6b   : > { %503 = vmatmul.bf16.gmra.mxu2 %v1004_v30  ;;  %513 = vmatmul.bf16.gmra.mxu3 %v1006_v31 }
  0xd7   : > { %v479_v32 = vpop.f32.mrf.mxu0  ;;  %v489_v33 = vpop.f32.mrf.mxu1 }
  0xde   : > { %v499_v34 = vpop.f32.mrf.mxu2  ;;  %v1438_v35 = vpop.f32.mrf.mxu3 }
  0xdf   : > { %v481_v36 = vpop.f32.mrf.mxu0  ;;  %v491_v37 = vpop.f32.mrf.mxu1 }
  0xe6   : > { %v501_v38 = vpop.f32.mrf.mxu2  ;;  %v1440_v39 = vpop.f32.mrf.mxu3 }
  0xe7   : > { %v484_v40 = vpop.f32.mrf.mxu0  ;;  %v494_v41 = vpop.f32.mrf.mxu1 }
  0xee   : > { %v504_v42 = vpop.f32.mrf.mxu2  ;;  %v1442_v43 = vpop.f32.mrf.mxu3 }
  0xef   : > { %v486_v44 = vpop.f32.mrf.mxu0  ;;  %v496_v45 = vpop.f32.mrf.mxu1 }
  0xf2   : > { %522 = sbr.rel (%p954_p0) target bundleno = 263 (0x107), region = 85 }
  0xf6   : > { %v506_v46 = vpop.f32.mrf.mxu2  ;;  %v1444_v47 = vpop.f32.mrf.mxu3 }
  0xf7   : > { %523 = vst [vmem:[#allocation2 + $0x30] sm:$0xff] %v479_v32 }
  0xf8   : > { %524 = vst [vmem:[#allocation2] sm:$0xff] %v481_v36 }
  0xf9   : > { %525 = vst [vmem:[#allocation2 + $0x58] sm:$0xff] %v484_v40 }
  0xfa   : > { %526 = vst [vmem:[#allocation2 + $0x18] sm:$0xff] %v486_v44 }
  0xfb   : > { %527 = vst [vmem:[#allocation2 + $0x50] sm:$0xff] %v489_v33 }
  0xfc   : > { %528 = vst [vmem:[#allocation2 + $0x68] sm:$0xff] %v491_v37 }
  0xfd   : > { %529 = vst [vmem:[#allocation2 + $0x8] sm:$0xff] %v494_v41 }
  0xfe   : > { %530 = vst [vmem:[#allocation2 + $0x48] sm:$0xff] %v496_v45 }
  0xff   : > { %531 = vst [vmem:[#allocation2 + $0x40] sm:$0xff] %v499_v34 }
 0x100   : > { %532 = vst [vmem:[#allocation2 + $0x20] sm:$0xff] %v501_v38 }
 0x101   : > { %533 = vst [vmem:[#allocation2 + $0x10] sm:$0xff] %v504_v42 }
 0x102   : > { %534 = vst [vmem:[#allocation2 + $0x38] sm:$0xff] %v506_v46 }
 0x103   : > { %535 = vst [vmem:[#allocation2 + $0x60] sm:$0xff] %v1438_v35 }
 0x104   : > { %536 = vst [vmem:[#allocation2 + $0x70] sm:$0xff] %v1440_v39 }
 0x105   : > { %537 = vst [vmem:[#allocation2 + $0x78] sm:$0xff] %v1442_v43 }
 0x106   : > { %538 = vst [vmem:[#allocation2 + $0x28] sm:$0xff] %v1444_v47 }
 0x107 PF: > { %p955_p1 = scmp.le.s32.totalorder %s1253_s17, 0 }
 0x109   : > { %542 = sbr.rel (%p955_p1) target bundleno = 289 (0x121), region = 89 }
 0x10e   : > { %v543_v48 = vld [vmem:[#allocation2 + $0x30] sm:$0xff]  ;;  %v544_v49 = vld [vmem:[#allocation2] sm:$0xff]  ;;  %v545_v50 = vld [vmem:[#allocation2 + $0x58] sm:$0xff] }
 0x10f   : > { %v559_v51 = vadd.f32 %v543_v48, %v479_v32  ;;  %v560_v52 = vadd.f32 %v544_v49, %v481_v36  ;;  %v561_v53 = vadd.f32 %v545_v50, %v484_v40  ;;  %v546_v54 = vld [vmem:[#allocation2 + $0x18] sm:$0xff]  ;;  %v547_v55 = vld [vmem:[#allocation2 + $0x50] sm:$0xff]  ;;  %v548_v56 = vld [vmem:[#allocation2 + $0x68] sm:$0xff] }
 0x110   : > { %v562_v57 = vadd.f32 %v546_v54, %v486_v44  ;;  %v549_v58 = vld [vmem:[#allocation2 + $0x8] sm:$0xff]  ;;  %v563_v59 = vadd.f32 %v547_v55, %v489_v33  ;;  %v564_v61 = vadd.f32 %v548_v56, %v491_v37  ;;  %v551_v62 = vld [vmem:[#allocation2 + $0x40] sm:$0xff]  ;;  %v553_v2 = vld [vmem:[#allocation2 + $0x10] sm:$0xff] }
 0x111   : > { %575 = vst [vmem:[#allocation2 + $0x30] sm:$0xff] %v559_v51  ;;  %v550_v60 = vld [vmem:[#allocation2 + $0x48] sm:$0xff]  ;;  %v565_v63 = vadd.f32 %v549_v58, %v494_v41  ;;  %v552_v0 = vld [vmem:[#allocation2 + $0x20] sm:$0xff]  ;;  %v567_v3 = vadd.f32 %v551_v62, %v499_v34  ;;  %v554_v4 = vld [vmem:[#allocation2 + $0x38] sm:$0xff]  ;;  %v569_v7 = vadd.f32 %v553_v2, %v504_v42 }
 0x112   : > { %576 = vst [vmem:[#allocation2] sm:$0xff] %v560_v52  ;;  %v566_v1 = vadd.f32 %v550_v60, %v496_v45  ;;  %v568_v5 = vadd.f32 %v552_v0, %v501_v38  ;;  %v555_v6 = vld [vmem:[#allocation2 + $0x60] sm:$0xff]  ;;  %v556_v8 = vld [vmem:[#allocation2 + $0x70] sm:$0xff]  ;;  %v570_v9 = vadd.f32 %v554_v4, %v506_v46  ;;  %v557_v10 = vld [vmem:[#allocation2 + $0x78] sm:$0xff] }
 0x113   : > { %577 = vst [vmem:[#allocation2 + $0x58] sm:$0xff] %v561_v53  ;;  %v571_v11 = vadd.f32 %v555_v6, %v1438_v35  ;;  %v558_v12 = vld [vmem:[#allocation2 + $0x28] sm:$0xff]  ;;  %v572_v13 = vadd.f32 %v556_v8, %v1440_v39  ;;  %v573_v14 = vadd.f32 %v557_v10, %v1442_v43 }
 0x114   : > { %578 = vst [vmem:[#allocation2 + $0x18] sm:$0xff] %v562_v57  ;;  %v574_v15 = vadd.f32 %v558_v12, %v1444_v47 }
 0x115   : > { %579 = vst [vmem:[#allocation2 + $0x50] sm:$0xff] %v563_v59 }
 0x116   : > { %580 = vst [vmem:[#allocation2 + $0x68] sm:$0xff] %v564_v61 }
 0x117   : > { %581 = vst [vmem:[#allocation2 + $0x8] sm:$0xff] %v565_v63 }
 0x118   : > { %582 = vst [vmem:[#allocation2 + $0x48] sm:$0xff] %v566_v1 }
 0x119   : > { %583 = vst [vmem:[#allocation2 + $0x40] sm:$0xff] %v567_v3 }
 0x11a   : > { %584 = vst [vmem:[#allocation2 + $0x20] sm:$0xff] %v568_v5 }
 0x11b   : > { %585 = vst [vmem:[#allocation2 + $0x10] sm:$0xff] %v569_v7 }
 0x11c   : > { %586 = vst [vmem:[#allocation2 + $0x38] sm:$0xff] %v570_v9 }
 0x11d   : > { %587 = vst [vmem:[#allocation2 + $0x60] sm:$0xff] %v571_v11 }
 0x11e   : > { %588 = vst [vmem:[#allocation2 + $0x70] sm:$0xff] %v572_v13 }
 0x11f   : > { %589 = vst [vmem:[#allocation2 + $0x78] sm:$0xff] %v573_v14 }
 0x120   : > { %590 = vst [vmem:[#allocation2 + $0x28] sm:$0xff] %v574_v15 }
 0x121 PF: > { %p956_p2 = scmp.ne.s32.totalorder %s1253_s17, 2 }
 0x123   : > { %594 = sbr.rel (%p956_p2) target bundleno = 493 (0x1ed), region = 93 }
 0x128   : > { %v1014_v16 = vld [vmem:[#allocation4 + $0x38] sm:$0xff]  ;;  %v1013_v17 = vld [vmem:[#allocation4 + $0x30] sm:$0xff]  ;;  %v1012_v18 = vld [vmem:[#allocation4 + $0x28] sm:$0xff] }
 0x129   : > { %687 = vmatpush.bf16.msra.mxu0 %v1014_v16  ;;  %1086 = vmatpush.bf16.msra.mxu1 %v1014_v16  ;;  %v1011_v19 = vld [vmem:[#allocation4 + $0x20] sm:$0xff]  ;;  %v1010_v20 = vld [vmem:[#allocation4 + $0x18] sm:$0xff]  ;;  %v1009_v21 = vld [vmem:[#allocation4 + $0x10] sm:$0xff] }
 0x12a   : > { %1087 = vmatpush.bf16.msra.mxu2 %v1014_v16  ;;  %1088 = vmatpush.bf16.msra.mxu3 %v1014_v16  ;;  %v1008_v22 = vld [vmem:[#allocation4 + $0x8] sm:$0xff]  ;;  %v1007_v23 = vld [vmem:[#allocation4] sm:$0xff]  ;;  %v595_v24 = vld [vmem:[#allocation2 + $0x30] sm:$0xff] }
 0x12b   : > { %v596_v25 = vld [vmem:[#allocation2] sm:$0xff]  ;;  %v599_v26 = vld [vmem:[#allocation2 + $0x50] sm:$0xff]  ;;  %v600_v27 = vld [vmem:[#allocation2 + $0x68] sm:$0xff] }
 0x12c   : > { %v603_v28 = vld [vmem:[#allocation2 + $0x40] sm:$0xff]  ;;  %v608_v31 = vld [vmem:[#allocation2 + $0x70] sm:$0xff]  ;;  %v611_v32 = vpack.c.bf16 %v596_v25, %v595_v24  ;;  %v613_v33 = vpack.c.bf16 %v600_v27, %v599_v26  ;;  %v597_v36 = vld [vmem:[#allocation2 + $0x58] sm:$0xff] }
 0x12d   : > { %688 = vmatpush.bf16.msra.mxu0 %v1013_v17  ;;  %1089 = vmatpush.bf16.msra.mxu1 %v1013_v17  ;;  %v604_v29 = vld [vmem:[#allocation2 + $0x20] sm:$0xff]  ;;  %v598_v37 = vld [vmem:[#allocation2 + $0x18] sm:$0xff]  ;;  %v601_v38 = vld [vmem:[#allocation2 + $0x8] sm:$0xff] }
 0x12e   : > { %1090 = vmatpush.bf16.msra.mxu2 %v1013_v17  ;;  %1091 = vmatpush.bf16.msra.mxu3 %v1013_v17  ;;  %v607_v30 = vld [vmem:[#allocation2 + $0x60] sm:$0xff]  ;;  %v615_v34 = vpack.c.bf16 %v604_v29, %v603_v28  ;;  %v602_v39 = vld [vmem:[#allocation2 + $0x48] sm:$0xff]  ;;  %v605_v40 = vld [vmem:[#allocation2 + $0x10] sm:$0xff]  ;;  %v612_v44 = vpack.c.bf16 %v598_v37, %v597_v36 }
 0x12f   : > { %v617_v35 = vpack.c.bf16 %v608_v31, %v607_v30  ;;  %v606_v41 = vld [vmem:[#allocation2 + $0x38] sm:$0xff]  ;;  %v610_v43 = vld [vmem:[#allocation2 + $0x28] sm:$0xff]  ;;  %v614_v45 = vpack.c.bf16 %v602_v39, %v601_v38  ;;  %v1180_v50 = vld [vmem:[%s1492_s3] ss:$0 sm:$0xff] }
 0x130   : > { %v609_v42 = vld [vmem:[#allocation2 + $0x78] sm:$0xff]  ;;  %v616_v46 = vpack.c.bf16 %v606_v41, %v605_v40 }
 0x131   : > { %689 = vmatpush.bf16.msra.mxu0 %v1012_v18  ;;  %1092 = vmatpush.bf16.msra.mxu1 %v1012_v18  ;;  %v618_v47 = vpack.c.bf16 %v610_v43, %v609_v42 }
 0x132   : > { %1093 = vmatpush.bf16.msra.mxu2 %v1012_v18  ;;  %1094 = vmatpush.bf16.msra.mxu3 %v1012_v18 }
 0x135   : > { %690 = vmatpush.bf16.msra.mxu0 %v1011_v19  ;;  %1095 = vmatpush.bf16.msra.mxu1 %v1011_v19 }
 0x136   : > { %1096 = vmatpush.bf16.msra.mxu2 %v1011_v19  ;;  %1097 = vmatpush.bf16.msra.mxu3 %v1011_v19 }
 0x139   : > { %691 = vmatpush.bf16.msra.mxu0 %v1010_v20  ;;  %1098 = vmatpush.bf16.msra.mxu1 %v1010_v20 }
 0x13a   : > { %1099 = vmatpush.bf16.msra.mxu2 %v1010_v20  ;;  %1100 = vmatpush.bf16.msra.mxu3 %v1010_v20 }
 0x13d   : > { %692 = vmatpush.bf16.msra.mxu0 %v1009_v21  ;;  %1101 = vmatpush.bf16.msra.mxu1 %v1009_v21 }
 0x13e   : > { %1102 = vmatpush.bf16.msra.mxu2 %v1009_v21  ;;  %1103 = vmatpush.bf16.msra.mxu3 %v1009_v21 }
 0x141   : > { %693 = vmatpush.bf16.msra.mxu0 %v1008_v22  ;;  %1104 = vmatpush.bf16.msra.mxu1 %v1008_v22 }
 0x142   : > { %1105 = vmatpush.bf16.msra.mxu2 %v1008_v22  ;;  %1106 = vmatpush.bf16.msra.mxu3 %v1008_v22 }
 0x145   : > { %694 = vmatpush.bf16.msra.mxu0 %v1007_v23  ;;  %1107 = vmatpush.bf16.msra.mxu1 %v1007_v23 }
 0x146   : > { %1108 = vmatpush.bf16.msra.mxu2 %v1007_v23  ;;  %1109 = vmatpush.bf16.msra.mxu3 %v1007_v23 }
 0x148   : > { %695 = vmatmul.bf16.vlgmr.msra.gmra.mxu0 %v611_v32  ;;  %705 = vmatmul.bf16.vlgmr.msra.gmra.mxu1 %v613_v33 }
 0x149   : > { %715 = vmatmul.bf16.vlgmr.msra.gmra.mxu2 %v615_v34  ;;  %725 = vmatmul.bf16.vlgmr.msra.gmra.mxu3 %v617_v35 }
 0x158   : > { %700 = vmatmul.bf16.gmra.mxu0 %v612_v44  ;;  %710 = vmatmul.bf16.gmra.mxu1 %v614_v45 }
 0x159   : > { %720 = vmatmul.bf16.gmra.mxu2 %v616_v46  ;;  %730 = vmatmul.bf16.gmra.mxu3 %v618_v47 }
 0x1c5   : > { %v696_v48 = vpop.f32.mrf.mxu0  ;;  %v706_v49 = vpop.f32.mrf.mxu1 }
 0x1c6   : > { %v697_v51 = vadd.f32 %v1180_v50, %v696_v48  ;;  %v707_v52 = vadd.f32 %v1180_v50, %v706_v49 }
 0x1c8   : > { %v736_v59 = vmax.f32 %v697_v51, 0.0  ;;  %v740_v60 = vmax.f32 %v707_v52, 0.0 }
 0x1cc   : > { %v716_v53 = vpop.f32.mrf.mxu2  ;;  %v726_v54 = vpop.f32.mrf.mxu3 }
 0x1cd   : > { %v698_v55 = vpop.f32.mrf.mxu0  ;;  %v708_v56 = vpop.f32.mrf.mxu1  ;;  %v717_v1 = vadd.f32 %v1180_v50, %v716_v53  ;;  %v727_v2 = vadd.f32 %v1180_v50, %v726_v54 }
 0x1ce   : > { %v699_v57 = vadd.f32 %v1180_v50, %v698_v55  ;;  %v709_v58 = vadd.f32 %v1180_v50, %v708_v56 }
 0x1cf   : > { %v744_v9 = vmax.f32 %v717_v1, 0.0  ;;  %v748_v10 = vmax.f32 %v727_v2, 0.0 }
 0x1d0   : > { %v737_v61 = vmax.f32 %v699_v57, 0.0  ;;  %v741_v62 = vmax.f32 %v709_v58, 0.0 }
 0x1d2   : > { %v1018_v63 = vpack.c.bf16 %v737_v61, %v736_v59  ;;  %v1028_v0 = vpack.c.bf16 %v741_v62, %v740_v60 }
 0x1d4   : > { %1019 = vst [vmem:[%s1420_s5] sm:$0xff] %v1018_v63   ;;  %v718_v3 = vpop.f32.mrf.mxu2  ;;  %v728_v4 = vpop.f32.mrf.mxu3 }
 0x1d5   : > { %1056 = vst [vmem:[%s1420_s5 + $0x10] sm:$0xff] %v1028_v0   ;;  %v719_v5 = vadd.f32 %v1180_v50, %v718_v3  ;;  %v729_v6 = vadd.f32 %v1180_v50, %v728_v4  ;;  %v701_v7 = vpop.f32.mrf.mxu0  ;;  %v711_v8 = vpop.f32.mrf.mxu1 }
 0x1d6   : > { %v702_v15 = vadd.f32 %v1180_v50, %v701_v7  ;;  %v712_v16 = vadd.f32 %v1180_v50, %v711_v8 }
 0x1d7   : > { %v745_v11 = vmax.f32 %v719_v5, 0.0  ;;  %v749_v12 = vmax.f32 %v729_v6, 0.0 }
 0x1d8   : > { %v738_v23 = vmax.f32 %v702_v15, 0.0  ;;  %v742_v24 = vmax.f32 %v712_v16, 0.0 }
 0x1d9   : > { %v1038_v13 = vpack.c.bf16 %v745_v11, %v744_v9  ;;  %v1048_v14 = vpack.c.bf16 %v749_v12, %v748_v10 }
 0x1db   : > { %1058 = vst [vmem:[%s1420_s5 + $0x20] sm:$0xff] %v1038_v13  }
 0x1dc   : > { %1060 = vst [vmem:[%s1420_s5 + $0x30] sm:$0xff] %v1048_v14   ;;  %v721_v17 = vpop.f32.mrf.mxu2  ;;  %v731_v18 = vpop.f32.mrf.mxu3 }
 0x1dd   : > { %v703_v19 = vpop.f32.mrf.mxu0  ;;  %v713_v20 = vpop.f32.mrf.mxu1  ;;  %v722_v29 = vadd.f32 %v1180_v50, %v721_v17  ;;  %v732_v30 = vadd.f32 %v1180_v50, %v731_v18 }
 0x1de   : > { %v704_v21 = vadd.f32 %v1180_v50, %v703_v19  ;;  %v714_v22 = vadd.f32 %v1180_v50, %v713_v20 }
 0x1df   : > { %v746_v35 = vmax.f32 %v722_v29, 0.0  ;;  %v750_v36 = vmax.f32 %v732_v30, 0.0 }
 0x1e0   : > { %v739_v25 = vmax.f32 %v704_v21, 0.0  ;;  %v743_v26 = vmax.f32 %v714_v22, 0.0 }
 0x1e2   : > { %v1023_v27 = vpack.c.bf16 %v739_v25, %v738_v23  ;;  %v1033_v28 = vpack.c.bf16 %v743_v26, %v742_v24 }
 0x1e4   : > { %1055 = vst [vmem:[%s1420_s5 + $0x8] sm:$0xff] %v1023_v27   ;;  %v723_v31 = vpop.f32.mrf.mxu2  ;;  %v733_v32 = vpop.f32.mrf.mxu3 }
 0x1e5   : > { %1057 = vst [vmem:[%s1420_s5 + $0x18] sm:$0xff] %v1033_v28   ;;  %v724_v33 = vadd.f32 %v1180_v50, %v723_v31  ;;  %v734_v34 = vadd.f32 %v1180_v50, %v733_v32 }
 0x1e7   : > { %v747_v37 = vmax.f32 %v724_v33, 0.0  ;;  %v751_v38 = vmax.f32 %v734_v34, 0.0 }
 0x1e9   : > { %v1043_v39 = vpack.c.bf16 %v747_v37, %v746_v35  ;;  %v1053_v40 = vpack.c.bf16 %v751_v38, %v750_v36 }
 0x1eb   : > { %1059 = vst [vmem:[%s1420_s5 + $0x28] sm:$0xff] %v1043_v39  }
 0x1ec   : > { %1061 = vst [vmem:[%s1420_s5 + $0x38] sm:$0xff] %v1053_v40  }
 0x1ed PF: > { %s15_s21 = sadd.s32 1, %s1269_s21   ;;  %s1497_s15 = smov %s1249_s16 }
 0x1ee   : > { %p12_p3 = scmp.ge.s32.totalorder %s15_s21, 11   ;;  %s1498_s16 = smov %s1370_s9 }
 0x1ef   : > { %s1499_s17 = smov %s1261_s19  ;;  %s1500_s18 = smov %s1265_s20 }
 0x1f0   : > { %s1501_s19 = smov %s1504_s23  ;;  %s1502_s20 = smov %s1508_s24 }
 0x1f1   :  { %14 = sbr.rel (!%p12_p3) target bundleno = 4 (0x4), region = 130 }
 0x1f6   :  { %806 = vsyncpa [#allocation5], 1 }
 0x1f7   :  { %808 = vsyncpa [#allocation5 + $0x1], 1 }

// kernel: gcn_classification.3
= control target key start
LH: loop header
LB: loop body
LE: loop exit
PB: predicated region body
PF: predicated region fallthrough
CT: control target
= control target key end

     0   :  { %9 = vsyncpa [#allocation5], 0  ;;  %s1220_s15 = smov 0   ;;  %s1222_s16 = smov 0   ;;  %s1418_s0 = inlined_call_operand.vmem [shape: bf16[384,384], index: 0, kind: input, shape index: {}]   ;;  %s1419_s1 = inlined_call_operand.vmem [shape: bf16[384,128], index: 1, kind: input, shape index: {}]   ;;  %s1420_s2 = inlined_call_operand.hbm [shape: bf16[128,128], index: 2, kind: input, shape index: {}]   ;;  %s1421_s3 = inlined_call_operand.vmem [shape: f32[1,128], index: 3, kind: input, shape index: {}]   ;;  %s1422_s4 = inlined_call_operand.vmem [shape: f32[384,128], index: 4, kind: output, shape index: {}]  }
   0x1   :  { %s1224_s17 = smov 0   ;;  %s1226_s18 = smov 0  }
   0x2   :  { %s1228_s19 = smov 0   ;;  %s1230_s20 = smov 0  }
   0x3   :  { %s1232_s21 = smov 0  }
   0x4 LB: > { %s842_s22 = sadd.s32 4294967295, %s1190_s21   ;;  %s24_s23 = sadd.s32 1, %s1182_s19  ;;  %s1190_s21 = sphi %s1232_s21, %s15_s21   ;;  %s1186_s20 = sphi %s1230_s20, %s1431_s20   ;;  %s1182_s19 = sphi %s1228_s19, %s1430_s19   ;;  %s1178_s18 = sphi %s1226_s18, %s1429_s18   ;;  %s1174_s17 = sphi %s1224_s17, %s1428_s17   ;;  %s1170_s16 = sphi %s1222_s16, %s1427_s16   ;;  %s1166_s15 = sphi %s1220_s15, %s1426_s15  }
   0x5   : > { %p25_p0 = scmp.ge.s32.totalorder %s24_s23, 3  ;;  %s27_s24 = sadd.s32 1, %s1186_s20 }
   0x6   : > { %s36_s25 = sadd.s32 1, %s1170_s16  ;;  %p43_p1 = scmp.ne.s32.totalorder %s1170_s16, %s1166_s15 }
   0x7   : > { %s1433_s23 = smov (%p25_p0, %s24_s23), 0  ;;  %s1435_s24 = smov (!%p25_p0, %s27_s24), %s1186_s20 }
   0x8   : > { %s32_s26 = ssub.s32 %s1182_s19, %s1433_s23  ;;  %p44_p2 = scmp.eq.s32.totalorder %s1190_s21, 0 }
   0x9   : > { %p29_p3 = scmp.ge.s32.totalorder %s1435_s24, 3  ;;  %p844_p4 = scmp.ge.s32.totalorder %s1190_s21, 1 }
   0xa   : > { %p1268_p5 = por %p44_p2, %p43_p1  ;;  %p149_p6 = scmp.lt.s32.totalorder %s1190_s21, 10 }
   0xb   : > { %s1437_s24 = smov (%p29_p3, %s1435_s24), 0  ;;  %p1281_p8 = scmp.eq.s32.totalorder %s842_s22, 0 }
   0xc   : > { %p1275_p7 = pnand %p844_p4, %p149_p6  ;;  %s31_s29 = ssub.s32 %s1186_s20, %s1437_s24 }
   0xd   : > { %s33_s5 = sor.u32 %s32_s26, %s31_s29  ;;  %s163_s8 = sshll.u32 %s1420_s2, 4  ;;  %s164_s8 = int_to_ptr.hbm [resolvable:$true] %s163_s8 }
   0xe   : > { %p1036_p9 = pneg %p1275_p7  ;;  %p34_p10 = scmp.eq.s32.totalorder %s33_s5, 0 }
   0xf   : > { %s1192_s10 = smov [#allocation4]   ;;  %s1193_s12 = smov 64  }
  0x10   : > { %s1291_s9 = scalar_select %p34_p10, %s1170_s16, %s36_s25  }
  0x11   : > { %s165_s11 = sshll.u32 %s1192_s10, 4  ;;  %p1037_p11 = pnand %p1281_p8, %p1036_p9  ;;  %s166_s11 = int_to_ptr.vmem [resolvable:$true] %s165_s11 }
  0x12   : > { %s1194_s13 = smov 4   ;;  %p846_p12 = scmp.ge.s32.totalorder %s1190_s21, 9 }
  0x13   : > { %1039 = dma.hbm_to_vmem [thread:$0]  (!%p1037_p11), %s164_s8, 1024, %s166_s11, [#allocation5], %s1193_s12, %s1193_s12, %s1194_s13  }
  0x14   : > { %178 = sbr.rel (%p846_p12) target bundleno = 48 (0x30), region = 28 }
  0x19   : > { %181 = sbr.rel (!%p1268_p5) target bundleno = 48 (0x30), region = 32  ;;  %s183_s14 = sand.u32 (%p1268_p5), 1, %s1170_s16  }
  0x1a   : > { %s1031_s22 = smul.u32 (%p1268_p5), 48, %s1186_s20  ;;  %s847_s25 = sshll.u32 (%p1268_p5), %s183_s14, 6 }
  0x1b   : > { %s185_s27 = scalar_lea.vmem (%p1268_p5), [#allocation3], %s847_s25 }
  0x1c   : > { %s188_s26 = sadd.s32 (%p1268_p5), %s1182_s19, %s1031_s22 }
  0x1d   : > { %s850_s29 = sshll.u32 (%p1268_p5), %s188_s26, 2 }
  0x1e   : > { %s1304_s7 = scalar_lea.vmem %s1418_s0, %s850_s29 }
  0x1f   : > { %v207_v0 = vld [vmem:[%s1304_s7] sm:$0xf]  ;;  %v209_v1 = vld [vmem:[%s1304_s7 + $0xc] sm:$0xf]  ;;  %v211_v2 = vld [vmem:[%s1304_s7 + $0x18] sm:$0xf] }
  0x20   : > { %208 = vst [vmem:[%s185_s27] sm:$0xf] %v207_v0  ;;  %v213_v3 = vld [vmem:[%s1304_s7 + $0x24] sm:$0xf]  ;;  %v215_v4 = vld [vmem:[%s1304_s7 + $0x30] sm:$0xf] }
  0x21   : > { %210 = vst [vmem:[%s185_s27 + $0x4] sm:$0xf] %v209_v1  ;;  %v217_v5 = vld [vmem:[%s1304_s7 + $0x3c] sm:$0xf]  ;;  %v219_v6 = vld [vmem:[%s1304_s7 + $0x48] sm:$0xf] }
  0x22   : > { %212 = vst [vmem:[%s185_s27 + $0x8] sm:$0xf] %v211_v2  ;;  %v221_v7 = vld [vmem:[%s1304_s7 + $0x54] sm:$0xf]  ;;  %v223_v8 = vld [vmem:[%s1304_s7 + $0x60] sm:$0xf] }
  0x23   : > { %214 = vst [vmem:[%s185_s27 + $0xc] sm:$0xf] %v213_v3  ;;  %v225_v9 = vld [vmem:[%s1304_s7 + $0x6c] sm:$0xf]  ;;  %v227_v10 = vld [vmem:[%s1304_s7 + $0x78] sm:$0xf] }
  0x24   : > { %216 = vst [vmem:[%s185_s27 + $0x10] sm:$0xf] %v215_v4  ;;  %v229_v11 = vld [vmem:[%s1304_s7 + $0x84] sm:$0xf]  ;;  %v231_v12 = vld [vmem:[%s1304_s7 + $0x90] sm:$0xf] }
  0x25   : > { %218 = vst [vmem:[%s185_s27 + $0x14] sm:$0xf] %v217_v5  ;;  %v233_v13 = vld [vmem:[%s1304_s7 + $0x9c] sm:$0xf]  ;;  %v235_v14 = vld [vmem:[%s1304_s7 + $0xa8] sm:$0xf] }
  0x26   : > { %220 = vst [vmem:[%s185_s27 + $0x18] sm:$0xf] %v219_v6  ;;  %v237_v15 = vld [vmem:[%s1304_s7 + $0xb4] sm:$0xf] }
  0x27   : > { %222 = vst [vmem:[%s185_s27 + $0x1c] sm:$0xf] %v221_v7 }
  0x28   : > { %224 = vst [vmem:[%s185_s27 + $0x20] sm:$0xf] %v223_v8 }
  0x29   : > { %226 = vst [vmem:[%s185_s27 + $0x24] sm:$0xf] %v225_v9 }
  0x2a   : > { %228 = vst [vmem:[%s185_s27 + $0x28] sm:$0xf] %v227_v10 }
  0x2b   : > { %230 = vst [vmem:[%s185_s27 + $0x2c] sm:$0xf] %v229_v11 }
  0x2c   : > { %232 = vst [vmem:[%s185_s27 + $0x30] sm:$0xf] %v231_v12 }
  0x2d   : > { %234 = vst [vmem:[%s185_s27 + $0x34] sm:$0xf] %v233_v13 }
  0x2e   : > { %236 = vst [vmem:[%s185_s27 + $0x38] sm:$0xf] %v235_v14 }
  0x2f   : > { %238 = vst [vmem:[%s185_s27 + $0x3c] sm:$0xf] %v237_v15 }
  0x30 PF: > { %297 = sbr.rel (%p1275_p7) target bundleno = 489 (0x1e9), region = 73  ;;  %s300_s8 = sand.u32 (!%p1275_p7), 1, %s1166_s15  }
  0x31   : > { %s852_s10 = sshll.u32 (!%p1275_p7), %s300_s8, 6 }
  0x32   : > { %s1325_s11 = scalar_lea.vmem (!%p1275_p7), [#allocation3], %s852_s10 }
  0x35   : > { %1161 = dma.done.wait (%p1281_p8), [#allocation5], 1024  }
  0x36   : > { %1163 = vsyncadd (%p1281_p8), [#allocation5], 4294966272  ;;  %s854_s12 = sshll.u32 %s1178_s18, 4  ;;  %s856_s13 = sshll.u32 %s1174_s17, 7  ;;  %v967_v24 = vld [vmem:[%s1325_s11] sm:$0xff]  ;;  %v969_v25 = vld [vmem:[%s1325_s11 + $0x10] sm:$0xff] }
  0x37   : > { %p332_p13 = scmp.lt.s32.totalorder %s854_s12, 47  ;;  %s338_s14 = sshra.s32 %s856_s13, 3  ;;  %v971_v26 = vld [vmem:[%s1325_s11 + $0x20] sm:$0xff]  ;;  %v973_v27 = vld [vmem:[%s1325_s11 + $0x30] sm:$0xff]  ;;  %v968_v28 = vld [vmem:[%s1325_s11 + $0x8] sm:$0xff] }
  0x38   : > { %s857_s22 = sshll.u32 %s338_s14, 2  ;;  %v970_v29 = vld [vmem:[%s1325_s11 + $0x18] sm:$0xff]  ;;  %v972_v30 = vld [vmem:[%s1325_s11 + $0x28] sm:$0xff]  ;;  %p922_p0 = scmp.ne.s32.totalorder %s1174_s17, 0 }
  0x39   : > { %s1439_s12 = smov (!%p332_p13, %s854_s12), 47  ;;  %s1336_s15 = scalar_lea.vmem %s1419_s1, %s857_s22  ;;  %v974_v31 = vld [vmem:[%s1325_s11 + $0x38] sm:$0xff] }
  0x3a   : > { %s855_s26 = sshll.u32 %s1439_s12, 3  ;;  %v966_v16 = vld [vmem:[%s1336_s15 + $0x38] sm:$0xff]  ;;  %v965_v17 = vld [vmem:[%s1336_s15 + $0x30] sm:$0xff]  ;;  %v964_v18 = vld [vmem:[%s1336_s15 + $0x28] sm:$0xff] }
  0x3b   : > { %s1341_s5 = scalar_lea.vmem %s1422_s4, %s855_s26  ;;  %470 = vmatpush.bf16.msra.mxu0 %v966_v16  ;;  %983 = vmatpush.bf16.msra.mxu1 %v966_v16  ;;  %v963_v19 = vld [vmem:[%s1336_s15 + $0x20] sm:$0xff]  ;;  %v962_v20 = vld [vmem:[%s1336_s15 + $0x18] sm:$0xff]  ;;  %v961_v21 = vld [vmem:[%s1336_s15 + $0x10] sm:$0xff] }
  0x3c   : > { %984 = vmatpush.bf16.msra.mxu2 %v966_v16  ;;  %985 = vmatpush.bf16.msra.mxu3 %v966_v16  ;;  %v960_v22 = vld [vmem:[%s1336_s15 + $0x8] sm:$0xff]  ;;  %v959_v23 = vld [vmem:[%s1336_s15] sm:$0xff] }
  0x3f   : > { %471 = vmatpush.bf16.msra.mxu0 %v965_v17  ;;  %986 = vmatpush.bf16.msra.mxu1 %v965_v17 }
  0x40   : > { %987 = vmatpush.bf16.msra.mxu2 %v965_v17  ;;  %988 = vmatpush.bf16.msra.mxu3 %v965_v17 }
  0x43   : > { %472 = vmatpush.bf16.msra.mxu0 %v964_v18  ;;  %989 = vmatpush.bf16.msra.mxu1 %v964_v18 }
  0x44   : > { %990 = vmatpush.bf16.msra.mxu2 %v964_v18  ;;  %991 = vmatpush.bf16.msra.mxu3 %v964_v18 }
  0x47   : > { %473 = vmatpush.bf16.msra.mxu0 %v963_v19  ;;  %992 = vmatpush.bf16.msra.mxu1 %v963_v19 }
  0x48   : > { %993 = vmatpush.bf16.msra.mxu2 %v963_v19  ;;  %994 = vmatpush.bf16.msra.mxu3 %v963_v19 }
  0x4b   : > { %474 = vmatpush.bf16.msra.mxu0 %v962_v20  ;;  %995 = vmatpush.bf16.msra.mxu1 %v962_v20 }
  0x4c   : > { %996 = vmatpush.bf16.msra.mxu2 %v962_v20  ;;  %997 = vmatpush.bf16.msra.mxu3 %v962_v20 }
  0x4f   : > { %475 = vmatpush.bf16.msra.mxu0 %v961_v21  ;;  %998 = vmatpush.bf16.msra.mxu1 %v961_v21 }
  0x50   : > { %999 = vmatpush.bf16.msra.mxu2 %v961_v21  ;;  %1000 = vmatpush.bf16.msra.mxu3 %v961_v21 }
  0x53   : > { %476 = vmatpush.bf16.msra.mxu0 %v960_v22  ;;  %1001 = vmatpush.bf16.msra.mxu1 %v960_v22 }
  0x54   : > { %1002 = vmatpush.bf16.msra.mxu2 %v960_v22  ;;  %1003 = vmatpush.bf16.msra.mxu3 %v960_v22 }
  0x57   : > { %477 = vmatpush.bf16.msra.mxu0 %v959_v23  ;;  %1004 = vmatpush.bf16.msra.mxu1 %v959_v23 }
  0x58   : > { %1005 = vmatpush.bf16.msra.mxu2 %v959_v23  ;;  %1006 = vmatpush.bf16.msra.mxu3 %v959_v23 }
  0x5a   : > { %478 = vmatmul.bf16.vlgmr.msra.gmra.mxu0 %v967_v24  ;;  %488 = vmatmul.bf16.vlgmr.msra.gmra.mxu1 %v969_v25 }
  0x5b   : > { %498 = vmatmul.bf16.vlgmr.msra.gmra.mxu2 %v971_v26  ;;  %508 = vmatmul.bf16.vlgmr.msra.gmra.mxu3 %v973_v27 }
  0x6a   : > { %483 = vmatmul.bf16.gmra.mxu0 %v968_v28  ;;  %493 = vmatmul.bf16.gmra.mxu1 %v970_v29 }
  0x6b   : > { %503 = vmatmul.bf16.gmra.mxu2 %v972_v30  ;;  %513 = vmatmul.bf16.gmra.mxu3 %v974_v31 }
  0xd7   : > { %v479_v32 = vpop.f32.mrf.mxu0  ;;  %v489_v33 = vpop.f32.mrf.mxu1 }
  0xde   : > { %v499_v34 = vpop.f32.mrf.mxu2  ;;  %v1359_v35 = vpop.f32.mrf.mxu3 }
  0xdf   : > { %v481_v36 = vpop.f32.mrf.mxu0  ;;  %v491_v37 = vpop.f32.mrf.mxu1 }
  0xe6   : > { %v501_v38 = vpop.f32.mrf.mxu2  ;;  %v1361_v39 = vpop.f32.mrf.mxu3 }
  0xe7   : > { %v484_v40 = vpop.f32.mrf.mxu0  ;;  %v494_v41 = vpop.f32.mrf.mxu1 }
  0xee   : > { %v504_v42 = vpop.f32.mrf.mxu2  ;;  %v1363_v43 = vpop.f32.mrf.mxu3 }
  0xef   : > { %v486_v44 = vpop.f32.mrf.mxu0  ;;  %v496_v45 = vpop.f32.mrf.mxu1 }
  0xf2   : > { %522 = sbr.rel (%p922_p0) target bundleno = 263 (0x107), region = 85 }
  0xf6   : > { %v506_v46 = vpop.f32.mrf.mxu2  ;;  %v1365_v47 = vpop.f32.mrf.mxu3 }
  0xf7   : > { %523 = vst [vmem:[#allocation2 + $0x30] sm:$0xff] %v479_v32 }
  0xf8   : > { %524 = vst [vmem:[#allocation2] sm:$0xff] %v481_v36 }
  0xf9   : > { %525 = vst [vmem:[#allocation2 + $0x58] sm:$0xff] %v484_v40 }
  0xfa   : > { %526 = vst [vmem:[#allocation2 + $0x18] sm:$0xff] %v486_v44 }
  0xfb   : > { %527 = vst [vmem:[#allocation2 + $0x50] sm:$0xff] %v489_v33 }
  0xfc   : > { %528 = vst [vmem:[#allocation2 + $0x68] sm:$0xff] %v491_v37 }
  0xfd   : > { %529 = vst [vmem:[#allocation2 + $0x8] sm:$0xff] %v494_v41 }
  0xfe   : > { %530 = vst [vmem:[#allocation2 + $0x48] sm:$0xff] %v496_v45 }
  0xff   : > { %531 = vst [vmem:[#allocation2 + $0x40] sm:$0xff] %v499_v34 }
 0x100   : > { %532 = vst [vmem:[#allocation2 + $0x20] sm:$0xff] %v501_v38 }
 0x101   : > { %533 = vst [vmem:[#allocation2 + $0x10] sm:$0xff] %v504_v42 }
 0x102   : > { %534 = vst [vmem:[#allocation2 + $0x38] sm:$0xff] %v506_v46 }
 0x103   : > { %535 = vst [vmem:[#allocation2 + $0x60] sm:$0xff] %v1359_v35 }
 0x104   : > { %536 = vst [vmem:[#allocation2 + $0x70] sm:$0xff] %v1361_v39 }
 0x105   : > { %537 = vst [vmem:[#allocation2 + $0x78] sm:$0xff] %v1363_v43 }
 0x106   : > { %538 = vst [vmem:[#allocation2 + $0x28] sm:$0xff] %v1365_v47 }
 0x107 PF: > { %p923_p1 = scmp.le.s32.totalorder %s1174_s17, 0 }
 0x109   : > { %542 = sbr.rel (%p923_p1) target bundleno = 289 (0x121), region = 89 }
 0x10e   : > { %v543_v48 = vld [vmem:[#allocation2 + $0x30] sm:$0xff]  ;;  %v544_v49 = vld [vmem:[#allocation2] sm:$0xff]  ;;  %v545_v50 = vld [vmem:[#allocation2 + $0x58] sm:$0xff] }
 0x10f   : > { %v559_v51 = vadd.f32 %v543_v48, %v479_v32  ;;  %v560_v52 = vadd.f32 %v544_v49, %v481_v36  ;;  %v561_v53 = vadd.f32 %v545_v50, %v484_v40  ;;  %v546_v54 = vld [vmem:[#allocation2 + $0x18] sm:$0xff]  ;;  %v547_v55 = vld [vmem:[#allocation2 + $0x50] sm:$0xff]  ;;  %v548_v56 = vld [vmem:[#allocation2 + $0x68] sm:$0xff] }
 0x110   : > { %v562_v57 = vadd.f32 %v546_v54, %v486_v44  ;;  %v549_v58 = vld [vmem:[#allocation2 + $0x8] sm:$0xff]  ;;  %v563_v59 = vadd.f32 %v547_v55, %v489_v33  ;;  %v564_v61 = vadd.f32 %v548_v56, %v491_v37  ;;  %v551_v62 = vld [vmem:[#allocation2 + $0x40] sm:$0xff]  ;;  %v553_v2 = vld [vmem:[#allocation2 + $0x10] sm:$0xff] }
 0x111   : > { %575 = vst [vmem:[#allocation2 + $0x30] sm:$0xff] %v559_v51  ;;  %v550_v60 = vld [vmem:[#allocation2 + $0x48] sm:$0xff]  ;;  %v565_v63 = vadd.f32 %v549_v58, %v494_v41  ;;  %v552_v0 = vld [vmem:[#allocation2 + $0x20] sm:$0xff]  ;;  %v567_v3 = vadd.f32 %v551_v62, %v499_v34  ;;  %v554_v4 = vld [vmem:[#allocation2 + $0x38] sm:$0xff]  ;;  %v569_v7 = vadd.f32 %v553_v2, %v504_v42 }
 0x112   : > { %576 = vst [vmem:[#allocation2] sm:$0xff] %v560_v52  ;;  %v566_v1 = vadd.f32 %v550_v60, %v496_v45  ;;  %v568_v5 = vadd.f32 %v552_v0, %v501_v38  ;;  %v555_v6 = vld [vmem:[#allocation2 + $0x60] sm:$0xff]  ;;  %v556_v8 = vld [vmem:[#allocation2 + $0x70] sm:$0xff]  ;;  %v570_v9 = vadd.f32 %v554_v4, %v506_v46  ;;  %v557_v10 = vld [vmem:[#allocation2 + $0x78] sm:$0xff] }
 0x113   : > { %577 = vst [vmem:[#allocation2 + $0x58] sm:$0xff] %v561_v53  ;;  %v571_v11 = vadd.f32 %v555_v6, %v1359_v35  ;;  %v558_v12 = vld [vmem:[#allocation2 + $0x28] sm:$0xff]  ;;  %v572_v13 = vadd.f32 %v556_v8, %v1361_v39  ;;  %v573_v14 = vadd.f32 %v557_v10, %v1363_v43 }
 0x114   : > { %578 = vst [vmem:[#allocation2 + $0x18] sm:$0xff] %v562_v57  ;;  %v574_v15 = vadd.f32 %v558_v12, %v1365_v47 }
 0x115   : > { %579 = vst [vmem:[#allocation2 + $0x50] sm:$0xff] %v563_v59 }
 0x116   : > { %580 = vst [vmem:[#allocation2 + $0x68] sm:$0xff] %v564_v61 }
 0x117   : > { %581 = vst [vmem:[#allocation2 + $0x8] sm:$0xff] %v565_v63 }
 0x118   : > { %582 = vst [vmem:[#allocation2 + $0x48] sm:$0xff] %v566_v1 }
 0x119   : > { %583 = vst [vmem:[#allocation2 + $0x40] sm:$0xff] %v567_v3 }
 0x11a   : > { %584 = vst [vmem:[#allocation2 + $0x20] sm:$0xff] %v568_v5 }
 0x11b   : > { %585 = vst [vmem:[#allocation2 + $0x10] sm:$0xff] %v569_v7 }
 0x11c   : > { %586 = vst [vmem:[#allocation2 + $0x38] sm:$0xff] %v570_v9 }
 0x11d   : > { %587 = vst [vmem:[#allocation2 + $0x60] sm:$0xff] %v571_v11 }
 0x11e   : > { %588 = vst [vmem:[#allocation2 + $0x70] sm:$0xff] %v572_v13 }
 0x11f   : > { %589 = vst [vmem:[#allocation2 + $0x78] sm:$0xff] %v573_v14 }
 0x120   : > { %590 = vst [vmem:[#allocation2 + $0x28] sm:$0xff] %v574_v15 }
 0x121 PF: > { %p924_p2 = scmp.ne.s32.totalorder %s1174_s17, 2 }
 0x123   : > { %594 = sbr.rel (%p924_p2) target bundleno = 489 (0x1e9), region = 93 }
 0x128   : > { %v982_v16 = vld [vmem:[#allocation4 + $0x38] sm:$0xff]  ;;  %v981_v17 = vld [vmem:[#allocation4 + $0x30] sm:$0xff]  ;;  %v980_v18 = vld [vmem:[#allocation4 + $0x28] sm:$0xff] }
 0x129   : > { %687 = vmatpush.bf16.msra.mxu0 %v982_v16  ;;  %1007 = vmatpush.bf16.msra.mxu1 %v982_v16  ;;  %v979_v19 = vld [vmem:[#allocation4 + $0x20] sm:$0xff]  ;;  %v978_v20 = vld [vmem:[#allocation4 + $0x18] sm:$0xff]  ;;  %v977_v21 = vld [vmem:[#allocation4 + $0x10] sm:$0xff] }
 0x12a   : > { %1008 = vmatpush.bf16.msra.mxu2 %v982_v16  ;;  %1009 = vmatpush.bf16.msra.mxu3 %v982_v16  ;;  %v976_v22 = vld [vmem:[#allocation4 + $0x8] sm:$0xff]  ;;  %v975_v23 = vld [vmem:[#allocation4] sm:$0xff]  ;;  %v595_v24 = vld [vmem:[#allocation2 + $0x30] sm:$0xff] }
 0x12b   : > { %v596_v25 = vld [vmem:[#allocation2] sm:$0xff]  ;;  %v599_v26 = vld [vmem:[#allocation2 + $0x50] sm:$0xff]  ;;  %v600_v27 = vld [vmem:[#allocation2 + $0x68] sm:$0xff] }
 0x12c   : > { %v603_v28 = vld [vmem:[#allocation2 + $0x40] sm:$0xff]  ;;  %v608_v31 = vld [vmem:[#allocation2 + $0x70] sm:$0xff]  ;;  %v611_v32 = vpack.c.bf16 %v596_v25, %v595_v24  ;;  %v613_v33 = vpack.c.bf16 %v600_v27, %v599_v26  ;;  %v597_v36 = vld [vmem:[#allocation2 + $0x58] sm:$0xff] }
 0x12d   : > { %688 = vmatpush.bf16.msra.mxu0 %v981_v17  ;;  %1010 = vmatpush.bf16.msra.mxu1 %v981_v17  ;;  %v604_v29 = vld [vmem:[#allocation2 + $0x20] sm:$0xff]  ;;  %v598_v37 = vld [vmem:[#allocation2 + $0x18] sm:$0xff]  ;;  %v601_v38 = vld [vmem:[#allocation2 + $0x8] sm:$0xff] }
 0x12e   : > { %1011 = vmatpush.bf16.msra.mxu2 %v981_v17  ;;  %1012 = vmatpush.bf16.msra.mxu3 %v981_v17  ;;  %v607_v30 = vld [vmem:[#allocation2 + $0x60] sm:$0xff]  ;;  %v615_v34 = vpack.c.bf16 %v604_v29, %v603_v28  ;;  %v602_v39 = vld [vmem:[#allocation2 + $0x48] sm:$0xff]  ;;  %v605_v40 = vld [vmem:[#allocation2 + $0x10] sm:$0xff]  ;;  %v612_v44 = vpack.c.bf16 %v598_v37, %v597_v36 }
 0x12f   : > { %v617_v35 = vpack.c.bf16 %v608_v31, %v607_v30  ;;  %v606_v41 = vld [vmem:[#allocation2 + $0x38] sm:$0xff]  ;;  %v610_v43 = vld [vmem:[#allocation2 + $0x28] sm:$0xff]  ;;  %v614_v45 = vpack.c.bf16 %v602_v39, %v601_v38  ;;  %v1101_v48 = vld [vmem:[%s1421_s3] ss:$0 sm:$0xff] }
 0x130   : > { %v609_v42 = vld [vmem:[#allocation2 + $0x78] sm:$0xff]  ;;  %v616_v46 = vpack.c.bf16 %v606_v41, %v605_v40 }
 0x131   : > { %689 = vmatpush.bf16.msra.mxu0 %v980_v18  ;;  %1013 = vmatpush.bf16.msra.mxu1 %v980_v18  ;;  %v618_v47 = vpack.c.bf16 %v610_v43, %v609_v42 }
 0x132   : > { %1014 = vmatpush.bf16.msra.mxu2 %v980_v18  ;;  %1015 = vmatpush.bf16.msra.mxu3 %v980_v18 }
 0x135   : > { %690 = vmatpush.bf16.msra.mxu0 %v979_v19  ;;  %1016 = vmatpush.bf16.msra.mxu1 %v979_v19 }
 0x136   : > { %1017 = vmatpush.bf16.msra.mxu2 %v979_v19  ;;  %1018 = vmatpush.bf16.msra.mxu3 %v979_v19 }
 0x139   : > { %691 = vmatpush.bf16.msra.mxu0 %v978_v20  ;;  %1019 = vmatpush.bf16.msra.mxu1 %v978_v20 }
 0x13a   : > { %1020 = vmatpush.bf16.msra.mxu2 %v978_v20  ;;  %1021 = vmatpush.bf16.msra.mxu3 %v978_v20 }
 0x13d   : > { %692 = vmatpush.bf16.msra.mxu0 %v977_v21  ;;  %1022 = vmatpush.bf16.msra.mxu1 %v977_v21 }
 0x13e   : > { %1023 = vmatpush.bf16.msra.mxu2 %v977_v21  ;;  %1024 = vmatpush.bf16.msra.mxu3 %v977_v21 }
 0x141   : > { %693 = vmatpush.bf16.msra.mxu0 %v976_v22  ;;  %1025 = vmatpush.bf16.msra.mxu1 %v976_v22 }
 0x142   : > { %1026 = vmatpush.bf16.msra.mxu2 %v976_v22  ;;  %1027 = vmatpush.bf16.msra.mxu3 %v976_v22 }
 0x145   : > { %694 = vmatpush.bf16.msra.mxu0 %v975_v23  ;;  %1028 = vmatpush.bf16.msra.mxu1 %v975_v23 }
 0x146   : > { %1029 = vmatpush.bf16.msra.mxu2 %v975_v23  ;;  %1030 = vmatpush.bf16.msra.mxu3 %v975_v23 }
 0x148   : > { %695 = vmatmul.bf16.vlgmr.msra.gmra.mxu0 %v611_v32  ;;  %705 = vmatmul.bf16.vlgmr.msra.gmra.mxu1 %v613_v33 }
 0x149   : > { %715 = vmatmul.bf16.vlgmr.msra.gmra.mxu2 %v615_v34  ;;  %725 = vmatmul.bf16.vlgmr.msra.gmra.mxu3 %v617_v35 }
 0x158   : > { %700 = vmatmul.bf16.gmra.mxu0 %v612_v44  ;;  %710 = vmatmul.bf16.gmra.mxu1 %v614_v45 }
 0x159   : > { %720 = vmatmul.bf16.gmra.mxu2 %v616_v46  ;;  %730 = vmatmul.bf16.gmra.mxu3 %v618_v47 }
 0x1c5   : > { %v696_v49 = vpop.f32.mrf.mxu0  ;;  %v706_v50 = vpop.f32.mrf.mxu1 }
 0x1c6   : > { %v697_v51 = vadd.f32 %v1101_v48, %v696_v49  ;;  %v707_v52 = vadd.f32 %v1101_v48, %v706_v50 }
 0x1c8   : > { %736 = vst [vmem:[%s1341_s5] sm:$0xff] %v697_v51 }
 0x1c9   : > { %740 = vst [vmem:[%s1341_s5 + $0x20] sm:$0xff] %v707_v52 }
 0x1cc   : > { %v716_v53 = vpop.f32.mrf.mxu2  ;;  %v726_v54 = vpop.f32.mrf.mxu3 }
 0x1cd   : > { %v717_v55 = vadd.f32 %v1101_v48, %v716_v53  ;;  %v727_v56 = vadd.f32 %v1101_v48, %v726_v54  ;;  %v698_v57 = vpop.f32.mrf.mxu0  ;;  %v708_v58 = vpop.f32.mrf.mxu1 }
 0x1ce   : > { %v699_v59 = vadd.f32 %v1101_v48, %v698_v57  ;;  %v709_v60 = vadd.f32 %v1101_v48, %v708_v58 }
 0x1cf   : > { %744 = vst [vmem:[%s1341_s5 + $0x40] sm:$0xff] %v717_v55 }
 0x1d0   : > { %748 = vst [vmem:[%s1341_s5 + $0x60] sm:$0xff] %v727_v56 }
 0x1d1   : > { %737 = vst [vmem:[%s1341_s5 + $0x8] sm:$0xff] %v699_v59 }
 0x1d2   : > { %741 = vst [vmem:[%s1341_s5 + $0x28] sm:$0xff] %v709_v60 }
 0x1d4   : > { %v718_v61 = vpop.f32.mrf.mxu2  ;;  %v728_v62 = vpop.f32.mrf.mxu3 }
 0x1d5   : > { %v719_v63 = vadd.f32 %v1101_v48, %v718_v61  ;;  %v729_v0 = vadd.f32 %v1101_v48, %v728_v62  ;;  %v701_v1 = vpop.f32.mrf.mxu0  ;;  %v711_v2 = vpop.f32.mrf.mxu1 }
 0x1d6   : > { %v702_v3 = vadd.f32 %v1101_v48, %v701_v1  ;;  %v712_v4 = vadd.f32 %v1101_v48, %v711_v2 }
 0x1d7   : > { %745 = vst [vmem:[%s1341_s5 + $0x48] sm:$0xff] %v719_v63 }
 0x1d8   : > { %749 = vst [vmem:[%s1341_s5 + $0x68] sm:$0xff] %v729_v0 }
 0x1d9   : > { %738 = vst [vmem:[%s1341_s5 + $0x10] sm:$0xff] %v702_v3 }
 0x1da   : > { %742 = vst [vmem:[%s1341_s5 + $0x30] sm:$0xff] %v712_v4 }
 0x1dc   : > { %v721_v5 = vpop.f32.mrf.mxu2  ;;  %v731_v6 = vpop.f32.mrf.mxu3 }
 0x1dd   : > { %v722_v7 = vadd.f32 %v1101_v48, %v721_v5  ;;  %v732_v8 = vadd.f32 %v1101_v48, %v731_v6  ;;  %v703_v9 = vpop.f32.mrf.mxu0  ;;  %v713_v10 = vpop.f32.mrf.mxu1 }
 0x1de   : > { %v704_v11 = vadd.f32 %v1101_v48, %v703_v9  ;;  %v714_v12 = vadd.f32 %v1101_v48, %v713_v10 }
 0x1df   : > { %746 = vst [vmem:[%s1341_s5 + $0x50] sm:$0xff] %v722_v7 }
 0x1e0   : > { %750 = vst [vmem:[%s1341_s5 + $0x70] sm:$0xff] %v732_v8 }
 0x1e1   : > { %739 = vst [vmem:[%s1341_s5 + $0x18] sm:$0xff] %v704_v11 }
 0x1e2   : > { %743 = vst [vmem:[%s1341_s5 + $0x38] sm:$0xff] %v714_v12 }
 0x1e4   : > { %v723_v13 = vpop.f32.mrf.mxu2  ;;  %v733_v14 = vpop.f32.mrf.mxu3 }
 0x1e5   : > { %v724_v15 = vadd.f32 %v1101_v48, %v723_v13  ;;  %v734_v16 = vadd.f32 %v1101_v48, %v733_v14 }
 0x1e7   : > { %747 = vst [vmem:[%s1341_s5 + $0x58] sm:$0xff] %v724_v15 }
 0x1e8   : > { %751 = vst [vmem:[%s1341_s5 + $0x78] sm:$0xff] %v734_v16 }
 0x1e9 PF: > { %s15_s21 = sadd.s32 1, %s1190_s21   ;;  %s1426_s15 = smov %s1170_s16 }
 0x1ea   : > { %p12_p3 = scmp.ge.s32.totalorder %s15_s21, 11   ;;  %s1427_s16 = smov %s1291_s9 }
 0x1eb   : > { %s1428_s17 = smov %s1182_s19  ;;  %s1429_s18 = smov %s1186_s20 }
 0x1ec   : > { %s1430_s19 = smov %s1433_s23  ;;  %s1431_s20 = smov %s1437_s24 }
 0x1ed   :  { %14 = sbr.rel (!%p12_p3) target bundleno = 4 (0x4), region = 130 }
 0x1f2   :  { %774 = vsyncpa [#allocation5], 1 }
 0x1f3   :  { %776 = vsyncpa [#allocation5 + $0x1], 1 }

</bundles_post_ra>
